<compile_context>
chip_gen: v7x
topology: tpu7x:2x2x1
jax: 0.10.0
libtpu: 0.0.40
codegen_flags: <defaults>
</compile_context>

<pallas_src>
import jax
import jax.numpy as jnp
from jax.experimental import pallas as pl
from jax.experimental.pallas import tpu as pltpu  # noqa: F401  (kept for TPU backend import)

INV_SQRT2 = 0.7071067811865476


def conv1x1_gelu_kernel(x_ref, w_ref, b_ref, o_ref):
    # x_ref: (Cin, M)   -- spatial rows on lanes (lane-dense)
    # w_ref: (Cout, Cin), b_ref: (Cout, 1), o_ref: (Cout, M)
    cin = x_ref.shape[0]
    w = w_ref[...]
    # Tiny K=3, N=8 contraction: do it as VPU broadcast multiply-adds instead
    # of routing a 3-deep reduction through the MXU.
    acc = w[:, 0:1] * x_ref[0:1, :]
    for ci in range(1, cin):
        acc = acc + w[:, ci:ci + 1] * x_ref[ci:ci + 1, :]
    v1 = acc + b_ref[...]
    # Exact erf-based GELU epilogue, fused on the full lane-dense tile.
    o_ref[...] = (0.5 * v1) * (jax.lax.erf(v1 * INV_SQRT2) + 1.0)


def conv1x1_pad1_gelu(x_nchw, weight, bias):
    """x_nchw: (N, Cin, H, W) f32; weight: (Cout, Cin) f32; bias: (Cout,) f32.
    Returns (N, Cout, H+2, W+2) f32, matching Conv2d(Cin, Cout, 1, stride=1,
    padding=1) followed by 0.5*v*(erf(v/sqrt(2))+1)."""
    N, Cin, H, W = x_nchw.shape
    Cout = weight.shape[0]
    Hp, Wp = H + 2, W + 2

    # (N, Cin, H, W) -> (Cin, M) with M = N*H*W.  Free reshape for N == 1.
    if N == 1:
        x_cm = x_nchw.reshape(Cin, H * W)
    else:
        x_cm = jnp.transpose(x_nchw, (1, 0, 2, 3)).reshape(Cin, N * H * W)
    M = x_cm.shape[1]
    M_pad = ((M + 127) // 128) * 128
    if M_pad != M:
        # Zero filler columns compute gelu(bias); they are sliced off below.
        x_cm = jnp.pad(x_cm, ((0, 0), (0, M_pad - M)))

    w = weight.astype(jnp.float32)                  # (Cout, Cin)
    b = bias.reshape(Cout, 1).astype(jnp.float32)   # (Cout, 1)

    # Single block, no grid: everything fits comfortably in VMEM on v5e/v6e/v7x.
    y = pl.pallas_call(
        conv1x1_gelu_kernel,
        out_shape=jax.ShapeDtypeStruct((Cout, M_pad), jnp.float32),
    )(x_cm.astype(jnp.float32), w, b)

    # Interior of the padded output (the only part that depends on x).
    interior = jnp.transpose(y[:, :M].reshape(Cout, N, H, W), (1, 0, 2, 3))

    # Border of the padded output: a 1x1 conv over zero padding yields just the
    # bias, so the border value is the per-channel constant gelu(bias[c]).
    gb = (0.5 * bias) * (jax.lax.erf(bias * INV_SQRT2) + 1.0)           # (Cout,)
    out = jnp.broadcast_to(gb[None, :, None, None], (N, Cout, Hp, Wp))
    out = out.at[:, :, 1:H + 1, 1:W + 1].set(interior)
    return out


def _reference(x_nchw, weight, bias):
    # Pure-JAX reference with exact f32 elementwise math (no MXU precision issues).
    xp = jnp.pad(x_nchw, ((0, 0), (0, 0), (1, 1), (1, 1)))
    v1 = (xp[:, None] * weight[None, :, :, None, None]).sum(axis=2)
    v1 = v1 + bias[None, :, None, None]
    return (v1 * 0.5) * (jax.lax.erf(v1 * INV_SQRT2) + 1.0)


if __name__ == "__main__":
    key = jax.random.PRNGKey(0)
    kx, kw, kb = jax.random.split(key, 3)

    # Small shapes consistent with the module: N=1, Cin=3 -> Cout=8, spatial=16.
    x = jax.random.normal(kx, (1, 3, 16, 16), dtype=jnp.float32)
    weight = jax.random.normal(kw, (8, 3), dtype=jnp.float32) * 0.1
    bias = jax.random.normal(kb, (8,), dtype=jnp.float32) * 0.1

    fn = jax.jit(conv1x1_pad1_gelu)
    out = jax.block_until_ready(fn(x, weight, bias))

    ref = _reference(x, weight, bias)
    assert out.shape == (1, 8, 18, 18), out.shape
    err = float(jnp.max(jnp.abs(out - ref)))
    assert jnp.allclose(out, ref, atol=1e-5, rtol=1e-5), err

    print("KERNEL_OK")
</pallas_src>

<mosaic_0001>
module attributes {stable_mosaic.version = 11 : i64} {
  func.func @conv1x1_gelu_kernel(%arg0: memref<3x256xf32, #tpu.memory_space<vmem>>, %arg1: memref<8x3xf32, #tpu.memory_space<vmem>>, %arg2: memref<8x1xf32, #tpu.memory_space<vmem>>, %arg3: memref<8x256xf32, #tpu.memory_space<vmem>>) attributes {dimension_semantics = [], scalar_prefetch = 0 : i64, scratch_operands = 0 : i64, tpu.core_type = #tpu.core_type<tc>} {
    %c0 = arith.constant 0 : index
    %c0_0 = arith.constant 0 : index
    %0 = vector.load %arg1[%c0, %c0_0] : memref<8x3xf32, #tpu.memory_space<vmem>>, vector<8x3xf32>
    %1 = vector.extract_strided_slice %0 {offsets = [0, 0], sizes = [8, 1], strides = [1, 1]} : vector<8x3xf32> to vector<8x1xf32>
    %c0_1 = arith.constant 0 : index
    %c0_2 = arith.constant 0 : index
    %2 = vector.load %arg0[%c0_1, %c0_2] : memref<3x256xf32, #tpu.memory_space<vmem>>, vector<1x256xf32>
    %3 = vector.broadcast %1 : vector<8x1xf32> to vector<8x256xf32>
    %4 = vector.broadcast %2 : vector<1x256xf32> to vector<8x256xf32>
    %5 = arith.mulf %3, %4 : vector<8x256xf32>
    %6 = vector.extract_strided_slice %0 {offsets = [0, 1], sizes = [8, 1], strides = [1, 1]} : vector<8x3xf32> to vector<8x1xf32>
    %c1 = arith.constant 1 : index
    %c0_3 = arith.constant 0 : index
    %7 = vector.load %arg0[%c1, %c0_3] : memref<3x256xf32, #tpu.memory_space<vmem>>, vector<1x256xf32>
    %8 = vector.broadcast %6 : vector<8x1xf32> to vector<8x256xf32>
    %9 = vector.broadcast %7 : vector<1x256xf32> to vector<8x256xf32>
    %10 = arith.mulf %8, %9 : vector<8x256xf32>
    %11 = arith.addf %5, %10 : vector<8x256xf32>
    %12 = vector.extract_strided_slice %0 {offsets = [0, 2], sizes = [8, 1], strides = [1, 1]} : vector<8x3xf32> to vector<8x1xf32>
    %c2 = arith.constant 2 : index
    %c0_4 = arith.constant 0 : index
    %13 = vector.load %arg0[%c2, %c0_4] : memref<3x256xf32, #tpu.memory_space<vmem>>, vector<1x256xf32>
    %14 = vector.broadcast %12 : vector<8x1xf32> to vector<8x256xf32>
    %15 = vector.broadcast %13 : vector<1x256xf32> to vector<8x256xf32>
    %16 = arith.mulf %14, %15 : vector<8x256xf32>
    %17 = arith.addf %11, %16 : vector<8x256xf32>
    %c0_5 = arith.constant 0 : index
    %c0_6 = arith.constant 0 : index
    %18 = vector.load %arg2[%c0_5, %c0_6] : memref<8x1xf32, #tpu.memory_space<vmem>>, vector<8x1xf32>
    %19 = vector.broadcast %18 : vector<8x1xf32> to vector<8x256xf32>
    %20 = arith.addf %17, %19 : vector<8x256xf32>
    %cst = arith.constant 5.000000e-01 : f32
    %21 = vector.broadcast %cst : f32 to vector<8x256xf32>
    %22 = arith.mulf %21, %20 : vector<8x256xf32>
    %cst_7 = arith.constant 0.707106769 : f32
    %23 = vector.broadcast %cst_7 : f32 to vector<8x256xf32>
    %24 = arith.mulf %20, %23 : vector<8x256xf32>
    %25 = math.erf %24 : vector<8x256xf32>
    %cst_8 = arith.constant 1.000000e+00 : f32
    %26 = vector.broadcast %cst_8 : f32 to vector<8x256xf32>
    %27 = arith.addf %25, %26 : vector<8x256xf32>
    %28 = arith.mulf %22, %27 : vector<8x256xf32>
    %c0_9 = arith.constant 0 : index
    %c0_10 = arith.constant 0 : index
    %29 = vector.load %arg3[%c0_9, %c0_10] : memref<8x256xf32, #tpu.memory_space<vmem>>, vector<8x256xf32>
    tpu.vector_store %arg3[%c0_9, %c0_10], %28 {strides = array<i32>} : memref<8x256xf32, #tpu.memory_space<vmem>>, vector<8x256xf32>,
    return
  }
}

</mosaic_0001>

<bundles_post_ra>
// kernel: conv1x1_pad1_gelu.1
= control target key start
LH: loop header
LB: loop body
LE: loop exit
PB: predicated region body
PF: predicated region fallthrough
CT: control target
= control target key end

     0   :  { %v114_v0 = vmov 0   ;;  %v115_v2 = vmov 2   ;;  %v116_v4 = vmov 1   ;;  %v22_v5 = vlaneseq  ;;  %s158_s1 = inlined_call_operand.vmem [shape: f32[8,3], index: 1, kind: input, shape index: {}]   ;;  %s159_s2 = inlined_call_operand.vmem [shape: f32[8,1], index: 2, kind: input, shape index: {}]   ;;  %s160_s0 = inlined_call_operand.vmem [shape: f32[3,256], index: 0, kind: input, shape index: {}]   ;;  %s161_s3 = inlined_call_operand.vmem [shape: f32[8,256], index: 3, kind: output, shape index: {}]  }
   0x1   :  { %105 = vset.pattern.permute.xlu0 %v114_v0  ;;  %v14_v1 = vld [vmem:[%s158_s1] sm:$0xff]  ;;  %107 = vset.pattern.permute.xlu1 %v115_v2 }
   0x2   :  { %18 = vperm.xlu0 %105, %v14_v1   ;;  %58 = vperm.xlu1 %107, %v14_v1   ;;  %v76_v3 = vld [vmem:[%s159_s2] sm:$0xff]  ;;  %v23_v6 = vshrl.u32 %v22_v5, 7 }
   0x3   :  { %v15_v9 = vld [vmem:[%s160_s0] ss:$4 sm:$0x3]  ;;  %v100_v10 = vld [vmem:[%s160_s0 + $0x1] ss:$4 sm:$0x3] }
   0x4   :  { %v24_v7 = vsub.s32 0, %v23_v6  ;;  %v28_v8 = vsub.s32 1, %v23_v6  ;;  %v101_v11 = vld [vmem:[%s160_s0 + $0x2] ss:$4 sm:$0x3] }
   0x6   :  { %106 = vset.pattern.permute.xlu0 %v116_v4  ;;  %108 = vset.pattern.permute.xlu1 %v114_v0  ;;  %v25_v13 = vrot.slane %v15_v9, %v24_v7  ;;  %v29_v14 = vrot.slane %v15_v9, %v28_v8  ;;  %v44_v15 = vrot.slane %v100_v10, %v24_v7 }
   0x7   :  { %37 = vperm.xlu0 %106, %v14_v1   ;;  %79 = vperm.xlu1 %108, %v76_v3   ;;  %v48_v16 = vrot.slane %v100_v10, %v28_v8  ;;  %v65_v17 = vrot.slane %v101_v11, %v24_v7  ;;  %v69_v18 = vrot.slane %v101_v11, %v28_v8 }
   0xb   :  { %109 = vset.pattern.permute.xlu0 %v114_v0 }
  0x81   :  { %v19_v12 = vpop.permute.xlu0 %18  ;;  %v59_v19 = vpop.permute.xlu1 %58 }
  0x82   :  { %v32_v20 = vmul.f32 %v25_v13, %v19_v12  ;;  %v33_v21 = vmul.f32 %v29_v14, %v19_v12  ;;  %v72_v25 = vmul.f32 %v65_v17, %v59_v19  ;;  %v73_v26 = vmul.f32 %v69_v18, %v59_v19 }
  0x86   :  { %v38_v22 = vpop.permute.xlu0 %37  ;;  %v80_v29 = vpop.permute.xlu1 %79 }
  0x87   :  { %v51_v23 = vmul.f32 %v44_v15, %v38_v22  ;;  %v52_v24 = vmul.f32 %v48_v16, %v38_v22 }
  0x89   :  { %v53_v27 = vadd.f32 %v51_v23, %v32_v20  ;;  %v54_v28 = vadd.f32 %v52_v24, %v33_v21 }
  0x8b   :  { %v74_v30 = vadd.f32 %v72_v25, %v53_v27  ;;  %v75_v31 = vadd.f32 %v73_v26, %v54_v28 }
  0x8d   :  { %v82_v32 = vadd.f32 %v80_v29, %v74_v30  ;;  %v83_v33 = vadd.f32 %v80_v29, %v75_v31 }
  0x8f   :  { %v86_v34 = vmul.f32 0.70710677, %v82_v32  ;;  %v87_v35 = vmul.f32 0.70710677, %v83_v33  ;;  %v84_v38 = vmul.f32 0.5, %v82_v32  ;;  %v85_v40 = vmul.f32 0.5, %v83_v33 }
  0x91   :  { %110 = verf.f32 %v86_v34 }
  0x92   :  { %112 = verf.f32 %v87_v35 }
  0x9b   :  { %v111_v36 = vpop.eup %110 }
  0x9c   :  { %v113_v37 = vpop.eup %112  ;;  %v90_v39 = vadd.f32 1.0, %v111_v36 }
  0x9d   :  { %v91_v41 = vadd.f32 1.0, %v113_v37 }
  0x9e   :  { %v92_v42 = vmul.f32 %v90_v39, %v84_v38 }
  0x9f   :  { %v93_v43 = vmul.f32 %v91_v41, %v85_v40 }
  0xa0   :  { %94 = vst [vmem:[%s161_s3] sm:$0xff] %v92_v42 }
  0xa1   :  { %95 = vst [vmem:[%s161_s3 + $0x8] sm:$0xff] %v93_v43 }

</bundles_post_ra>
